<compile_context>
chip_gen: v5e
topology: v5e:2x2
jax: 0.10.0
libtpu: 0.0.40
codegen_flags: <defaults>
</compile_context>

<pallas_src>
import functools

import jax
import jax.numpy as jnp
from jax.experimental import pallas as pl
from jax.experimental.pallas import tpu as pltpu


# ----------------------------------------------------------------------------
# Parameter construction (mirrors PyTorch module __init__ / weight_norm).
# ----------------------------------------------------------------------------
def weight_norm_effective(v, g):
    """PyTorch weight_norm (dim=0): w = g * v / ||v||, norm over (C_in, K)."""
    norm = jnp.sqrt(jnp.sum(v * v, axis=(1, 2), keepdims=True))  # (C_out,1,1)
    return g[:, None, None] * v / norm


def init_tcn_params(key, num_country, num_channels, kernel_size):
    num_inputs = num_country + 1
    blocks = []
    k = key
    in_ch = num_inputs
    for i, out_ch in enumerate(num_channels):
        k, k1, k2, k3, k4, k5 = jax.random.split(k, 6)
        v = jax.random.normal(k1, (out_ch, in_ch, kernel_size), jnp.float32)
        v = v / jnp.sqrt(float(in_ch * kernel_size))
        g = 1.0 + 0.1 * jax.random.normal(k2, (out_ch,), jnp.float32)
        w = weight_norm_effective(v, g)                    # (C_out, C_in, K)
        b = 0.1 * jax.random.normal(k3, (out_ch,), jnp.float32)
        blk = {
            "w_oik": w,                                    # for the lax.conv reference
            "w_kio": jnp.transpose(w, (2, 1, 0)),          # (K, C_in, C_out) for the kernel
            "b": b,
        }
        if in_ch != out_ch:                                # downsample 1x1 conv
            wd = jax.random.normal(k4, (out_ch, in_ch), jnp.float32) / jnp.sqrt(float(in_ch))
            bd = 0.1 * jax.random.normal(k5, (out_ch,), jnp.float32)
            blk["wd_oik"] = wd                             # (C_out, C_in)
            blk["wd_t"] = wd.T                             # (C_in, C_out)
            blk["bd"] = bd
        blocks.append(blk)
        in_ch = out_ch
    k, k1, k2 = jax.random.split(k, 3)
    fc_w = jax.random.normal(k1, (num_inputs, num_channels[-1]), jnp.float32)
    fc_w = fc_w / jnp.sqrt(float(num_channels[-1]))
    fc_b = 0.1 * jax.random.normal(k2, (num_inputs,), jnp.float32)
    return {"blocks": blocks, "fc_w": fc_w, "fc_w_t": fc_w.T, "fc_b": fc_b}


# ----------------------------------------------------------------------------
# Fused TemporalBlock kernel: conv (causal, dilated) + bias + chomp + ReLU
#                             + residual (downsample matmul or identity) + ReLU
#                             [+ optional fused fc Linear for the last block]
# ----------------------------------------------------------------------------
def _make_temporal_block_kernel(kernel_size, dilation, seq_len,
                                has_downsample, fuse_fc):
    pad = (kernel_size - 1) * dilation

    def kernel(*refs):
        idx = 0
        xpad_ref = refs[idx]; idx += 1   # (1, T+pad, C_in) causal left-padded input
        w_ref = refs[idx]; idx += 1      # (K, C_in, C_out) effective weight-normed conv
        b_ref = refs[idx]; idx += 1      # (1, C_out)
        if has_downsample:
            wd_ref = refs[idx]; idx += 1  # (C_in, C_out)
            bd_ref = refs[idx]; idx += 1  # (1, C_out)
        if fuse_fc:
            wf_ref = refs[idx]; idx += 1  # (C_out, n_out)
            bf_ref = refs[idx]; idx += 1  # (1, n_out)
        o_ref = refs[idx]

        xpad = xpad_ref[0]                               # (T+pad, C_in)
        c_out = w_ref.shape[-1]

        # Causal dilated conv as K statically-unrolled shifted matmuls (MXU).
        acc = jnp.zeros((seq_len, c_out), jnp.float32)
        for k in range(kernel_size):
            xk = xpad[k * dilation: k * dilation + seq_len, :]          # (T, C_in)
            acc = acc + jnp.dot(xk, w_ref[k], preferred_element_type=jnp.float32)
        conv = jnp.maximum(acc + b_ref[...], 0.0)        # bias + chomp'd causal + ReLU

        x_orig = xpad[pad: pad + seq_len, :]             # un-padded input (T, C_in)
        if has_downsample:
            res = jnp.dot(x_orig, wd_ref[...],
                          preferred_element_type=jnp.float32) + bd_ref[...]
        else:
            res = x_orig                                 # identity (C_in == C_out)
        h = jnp.maximum(conv + res, 0.0)                 # residual add + ReLU

        if fuse_fc:
            h = jnp.dot(h, wf_ref[...], preferred_element_type=jnp.float32) + bf_ref[...]
        o_ref[...] = h[None].astype(o_ref.dtype)

    return kernel


def temporal_block_forward(x_btc, w_kio, b, wd_t, bd, *, dilation, kernel_size,
                           fc_w_t=None, fc_b=None):
    """x_btc: (B, T, C_in) channel-last. Returns (B, T, C_out) or (B, T, n_out) if fc fused.

    `dilation` and `kernel_size` must be Python ints (static)."""
    B, T, C_in = x_btc.shape
    C_out = w_kio.shape[-1]
    pad = (kernel_size - 1) * dilation                   # static int
    x_pad = jnp.pad(x_btc, ((0, 0), (pad, 0), (0, 0)))   # causal left padding, once
    T_pad = T + pad

    has_downsample = wd_t is not None
    fuse_fc = fc_w_t is not None
    n_out = fc_w_t.shape[-1] if fuse_fc else C_out

    inputs = [x_pad, w_kio, b.reshape(1, C_out)]
    in_specs = [
        pl.BlockSpec((1, T_pad, C_in), lambda bi: (bi, 0, 0)),
        pl.BlockSpec((kernel_size, C_in, C_out), lambda bi: (0, 0, 0)),   # resident
        pl.BlockSpec((1, C_out), lambda bi: (0, 0)),                      # resident
    ]
    if has_downsample:
        inputs += [wd_t, bd.reshape(1, C_out)]
        in_specs += [
            pl.BlockSpec((C_in, C_out), lambda bi: (0, 0)),
            pl.BlockSpec((1, C_out), lambda bi: (0, 0)),
        ]
    if fuse_fc:
        inputs += [fc_w_t, fc_b.reshape(1, n_out)]
        in_specs += [
            pl.BlockSpec((C_out, n_out), lambda bi: (0, 0)),
            pl.BlockSpec((1, n_out), lambda bi: (0, 0)),
        ]

    kernel = _make_temporal_block_kernel(kernel_size, dilation, T,
                                         has_downsample, fuse_fc)

    return pl.pallas_call(
        kernel,
        out_shape=jax.ShapeDtypeStruct((B, T, n_out), x_btc.dtype),
        grid=(B,),                                         # >=2 parallel steps (v7x megacore)
        in_specs=in_specs,
        out_specs=pl.BlockSpec((1, T, n_out), lambda bi: (bi, 0, 0)),
        compiler_params=pltpu.CompilerParams(
            dimension_semantics=("parallel",),
            vmem_limit_bytes=32 * 1024 * 1024,             # explicit; safe on v5e/v6e/v7x
        ),
    )(*inputs)


# ----------------------------------------------------------------------------
# Full TCNModel forward (Pallas path) and pure-JAX reference.
# ----------------------------------------------------------------------------
@functools.partial(jax.jit, static_argnames=("kernel_size",))
def tcn_forward(x_sbc, params, kernel_size=2):
    """x_sbc: (seq_len, batch, num_country+1) — same layout the PyTorch forward expects."""
    h = jnp.transpose(x_sbc, (1, 0, 2))                    # (B, T, C) channel-last
    blocks = params["blocks"]
    for i, blk in enumerate(blocks):
        dilation = 2 ** i                                  # static (architecture), never traced
        is_last = i == len(blocks) - 1
        h = temporal_block_forward(
            h, blk["w_kio"], blk["b"], blk.get("wd_t"), blk.get("bd"),
            dilation=dilation, kernel_size=kernel_size,
            fc_w_t=params["fc_w_t"] if is_last else None,
            fc_b=params["fc_b"] if is_last else None,
        )
    return jnp.transpose(h, (1, 0, 2))                     # (S, B, num_country+1)


def tcn_reference(x_sbc, params, kernel_size=2):
    """Independent pure-JAX reference mirroring the PyTorch module exactly."""
    h = jnp.transpose(x_sbc, (1, 2, 0))                    # x.permute(1,2,0) -> (B, C, S)
    for i, blk in enumerate(params["blocks"]):
        dilation = 2 ** i
        pad = (kernel_size - 1) * dilation
        out = jax.lax.conv_general_dilated(
            h, blk["w_oik"], window_strides=(1,), padding=[(pad, pad)],
            rhs_dilation=(dilation,),
            dimension_numbers=("NCH", "OIH", "NCH"))
        out = out + blk["b"][None, :, None]
        out = out[:, :, : out.shape[2] - pad]              # Chomp1d
        out = jnp.maximum(out, 0.0)                        # relu1
        if "wd_oik" in blk:
            res = jax.lax.conv_general_dilated(
                h, blk["wd_oik"][:, :, None], window_strides=(1,), padding=[(0, 0)],
                dimension_numbers=("NCH", "OIH", "NCH")) + blk["bd"][None, :, None]
        else:
            res = h
        h = jnp.maximum(out + res, 0.0)                    # relu(out + res)
    y = jnp.transpose(h, (2, 0, 1))                        # y.permute(2,0,1) -> (S, B, C)
    return y @ params["fc_w"].T + params["fc_b"]           # fc


if __name__ == "__main__":
    # Small, module-consistent shapes.
    num_country = 7                      # -> num_inputs = num_outputs = 8
    num_channels = [16, 32, 32]          # blocks 1,2 have downsample; block 3 is identity-res
    kernel_size = 2
    seq_len = 16
    batch = 4

    key = jax.random.PRNGKey(0)
    kp, kx = jax.random.split(key)
    params = init_tcn_params(kp, num_country, num_channels, kernel_size)
    x = jax.random.normal(kx, (seq_len, batch, num_country + 1), jnp.float32)

    out = tcn_forward(x, params, kernel_size=kernel_size)
    out = jax.block_until_ready(out)

    ref = tcn_reference(x, params, kernel_size=kernel_size)
    assert out.shape == (seq_len, batch, num_country + 1), out.shape
    assert jnp.allclose(out, ref, atol=2e-4, rtol=2e-4), (
        "mismatch vs reference: max abs err = %e" % float(jnp.max(jnp.abs(out - ref))))

    print("KERNEL_OK")
</pallas_src>

<mosaic_0001>
module attributes {stable_mosaic.version = 11 : i64} {
  func.func @kernel(%arg0: i32, %arg1: memref<1x17x8xf32, #tpu.memory_space<vmem>>, %arg2: memref<2x8x16xf32, #tpu.memory_space<vmem>>, %arg3: memref<1x16xf32, #tpu.memory_space<vmem>>, %arg4: memref<8x16xf32, #tpu.memory_space<vmem>>, %arg5: memref<1x16xf32, #tpu.memory_space<vmem>>, %arg6: memref<1x16x16xf32, #tpu.memory_space<vmem>>) attributes {dimension_semantics = [#tpu.dimension_semantics<parallel>], iteration_bounds = array<i64: 4>, scalar_prefetch = 0 : i64, scratch_operands = 0 : i64, tpu.core_type = #tpu.core_type<tc>, window_params = [{transform_indices = @transform_0, window_bounds = array<i64: 1, 17, 8>}, {pipeline_mode = #tpu.pipeline_mode<synchronous>, transform_indices = @transform_1, window_bounds = array<i64: 2, 8, 16>}, {pipeline_mode = #tpu.pipeline_mode<synchronous>, transform_indices = @transform_2, window_bounds = array<i64: 1, 16>}, {pipeline_mode = #tpu.pipeline_mode<synchronous>, transform_indices = @transform_3, window_bounds = array<i64: 8, 16>}, {pipeline_mode = #tpu.pipeline_mode<synchronous>, transform_indices = @transform_4, window_bounds = array<i64: 1, 16>}, {transform_indices = @transform_5, window_bounds = array<i64: 1, 16, 16>}]} {
    %c0 = arith.constant 0 : index
    %c0_0 = arith.constant 0 : index
    %c0_1 = arith.constant 0 : index
    %0 = vector.load %arg1[%c0, %c0_0, %c0_1] : memref<1x17x8xf32, #tpu.memory_space<vmem>>, vector<1x17x8xf32>
    %1 = vector.shape_cast %0 : vector<1x17x8xf32> to vector<17x8xf32>
    %cst = arith.constant 0.000000e+00 : f32
    %2 = vector.broadcast %cst : f32 to vector<16x16xf32>
    %3 = vector.extract_strided_slice %1 {offsets = [0, 0], sizes = [16, 8], strides = [1, 1]} : vector<17x8xf32> to vector<16x8xf32>
    %c0_2 = arith.constant 0 : index
    %c0_3 = arith.constant 0 : index
    %c0_4 = arith.constant 0 : index
    %4 = vector.load %arg2[%c0_2, %c0_3, %c0_4] : memref<2x8x16xf32, #tpu.memory_space<vmem>>, vector<1x8x16xf32>
    %5 = vector.shape_cast %4 : vector<1x8x16xf32> to vector<8x16xf32>
    %cst_5 = arith.constant dense<0.000000e+00> : vector<16x16xf32>
    %6 = tpu.matmul %3, %5, %cst_5 {dimension_numbers = #tpu.dot_dimension_numbers<[1], [0], [0], [1], [0, 0, 1, 1], [], []>} : vector<16x8xf32>, vector<8x16xf32>, vector<16x16xf32> -> vector<16x16xf32>
    %7 = arith.addf %2, %6 : vector<16x16xf32>
    %8 = vector.extract_strided_slice %1 {offsets = [1, 0], sizes = [16, 8], strides = [1, 1]} : vector<17x8xf32> to vector<16x8xf32>
    %c1 = arith.constant 1 : index
    %c0_6 = arith.constant 0 : index
    %c0_7 = arith.constant 0 : index
    %9 = vector.load %arg2[%c1, %c0_6, %c0_7] : memref<2x8x16xf32, #tpu.memory_space<vmem>>, vector<1x8x16xf32>
    %10 = vector.shape_cast %9 : vector<1x8x16xf32> to vector<8x16xf32>
    %cst_8 = arith.constant dense<0.000000e+00> : vector<16x16xf32>
    %11 = tpu.matmul %8, %10, %cst_8 {dimension_numbers = #tpu.dot_dimension_numbers<[1], [0], [0], [1], [0, 0, 1, 1], [], []>} : vector<16x8xf32>, vector<8x16xf32>, vector<16x16xf32> -> vector<16x16xf32>
    %12 = arith.addf %7, %11 : vector<16x16xf32>
    %c0_9 = arith.constant 0 : index
    %c0_10 = arith.constant 0 : index
    %13 = vector.load %arg3[%c0_9, %c0_10] : memref<1x16xf32, #tpu.memory_space<vmem>>, vector<1x16xf32>
    %14 = vector.broadcast %13 : vector<1x16xf32> to vector<16x16xf32>
    %15 = arith.addf %12, %14 : vector<16x16xf32>
    %cst_11 = arith.constant 0.000000e+00 : f32
    %16 = vector.broadcast %cst_11 : f32 to vector<16x16xf32>
    %17 = arith.maximumf %15, %16 : vector<16x16xf32>
    %18 = vector.extract_strided_slice %1 {offsets = [1, 0], sizes = [16, 8], strides = [1, 1]} : vector<17x8xf32> to vector<16x8xf32>
    %c0_12 = arith.constant 0 : index
    %c0_13 = arith.constant 0 : index
    %19 = vector.load %arg4[%c0_12, %c0_13] : memref<8x16xf32, #tpu.memory_space<vmem>>, vector<8x16xf32>
    %cst_14 = arith.constant dense<0.000000e+00> : vector<16x16xf32>
    %20 = tpu.matmul %18, %19, %cst_14 {dimension_numbers = #tpu.dot_dimension_numbers<[1], [0], [0], [1], [0, 0, 1, 1], [], []>} : vector<16x8xf32>, vector<8x16xf32>, vector<16x16xf32> -> vector<16x16xf32>
    %c0_15 = arith.constant 0 : index
    %c0_16 = arith.constant 0 : index
    %21 = vector.load %arg5[%c0_15, %c0_16] : memref<1x16xf32, #tpu.memory_space<vmem>>, vector<1x16xf32>
    %22 = vector.broadcast %21 : vector<1x16xf32> to vector<16x16xf32>
    %23 = arith.addf %20, %22 : vector<16x16xf32>
    %24 = arith.addf %17, %23 : vector<16x16xf32>
    %cst_17 = arith.constant 0.000000e+00 : f32
    %25 = vector.broadcast %cst_17 : f32 to vector<16x16xf32>
    %26 = arith.maximumf %24, %25 : vector<16x16xf32>
    %27 = vector.shape_cast %26 : vector<16x16xf32> to vector<1x16x16xf32>
    %c0_18 = arith.constant 0 : index
    %c0_19 = arith.constant 0 : index
    %c0_20 = arith.constant 0 : index
    %28 = vector.load %arg6[%c0_18, %c0_19, %c0_20] : memref<1x16x16xf32, #tpu.memory_space<vmem>>, vector<1x16x16xf32>
    tpu.vector_store %arg6[%c0_18, %c0_19, %c0_20], %27 {strides = array<i32>} : memref<1x16x16xf32, #tpu.memory_space<vmem>>, vector<1x16x16xf32>,
    return
  }
  func.func @transform_0(%arg0: i32) -> (i32, i32, i32) {
    %c0_i32 = arith.constant 0 : i32
    %c0_i32_0 = arith.constant 0 : i32
    %c0_i32_1 = arith.constant 0 : i32
    return %arg0, %c0_i32, %c0_i32_0 : i32, i32, i32
  }
  func.func @transform_1(%arg0: i32) -> (i32, i32, i32) {
    %c0_i32 = arith.constant 0 : i32
    %c0_i32_0 = arith.constant 0 : i32
    %c0_i32_1 = arith.constant 0 : i32
    %c0_i32_2 = arith.constant 0 : i32
    return %c0_i32, %c0_i32_0, %c0_i32_1 : i32, i32, i32
  }
  func.func @transform_2(%arg0: i32) -> (i32, i32) {
    %c0_i32 = arith.constant 0 : i32
    %c0_i32_0 = arith.constant 0 : i32
    %c0_i32_1 = arith.constant 0 : i32
    return %c0_i32, %c0_i32_0 : i32, i32
  }
  func.func @transform_3(%arg0: i32) -> (i32, i32) {
    %c0_i32 = arith.constant 0 : i32
    %c0_i32_0 = arith.constant 0 : i32
    %c0_i32_1 = arith.constant 0 : i32
    return %c0_i32, %c0_i32_0 : i32, i32
  }
  func.func @transform_4(%arg0: i32) -> (i32, i32) {
    %c0_i32 = arith.constant 0 : i32
    %c0_i32_0 = arith.constant 0 : i32
    %c0_i32_1 = arith.constant 0 : i32
    return %c0_i32, %c0_i32_0 : i32, i32
  }
  func.func @transform_5(%arg0: i32) -> (i32, i32, i32) {
    %c0_i32 = arith.constant 0 : i32
    %c0_i32_0 = arith.constant 0 : i32
    %c0_i32_1 = arith.constant 0 : i32
    return %arg0, %c0_i32, %c0_i32_0 : i32, i32, i32
  }
}

module attributes {stable_mosaic.version = 11 : i64} {
  func.func @kernel(%arg0: i32, %arg1: memref<1x18x16xf32, #tpu.memory_space<vmem>>, %arg2: memref<2x16x32xf32, #tpu.memory_space<vmem>>, %arg3: memref<1x32xf32, #tpu.memory_space<vmem>>, %arg4: memref<16x32xf32, #tpu.memory_space<vmem>>, %arg5: memref<1x32xf32, #tpu.memory_space<vmem>>, %arg6: memref<1x16x32xf32, #tpu.memory_space<vmem>>) attributes {dimension_semantics = [#tpu.dimension_semantics<parallel>], iteration_bounds = array<i64: 4>, scalar_prefetch = 0 : i64, scratch_operands = 0 : i64, tpu.core_type = #tpu.core_type<tc>, window_params = [{transform_indices = @transform_0, window_bounds = array<i64: 1, 18, 16>}, {pipeline_mode = #tpu.pipeline_mode<synchronous>, transform_indices = @transform_1, window_bounds = array<i64: 2, 16, 32>}, {pipeline_mode = #tpu.pipeline_mode<synchronous>, transform_indices = @transform_2, window_bounds = array<i64: 1, 32>}, {pipeline_mode = #tpu.pipeline_mode<synchronous>, transform_indices = @transform_3, window_bounds = array<i64: 16, 32>}, {pipeline_mode = #tpu.pipeline_mode<synchronous>, transform_indices = @transform_4, window_bounds = array<i64: 1, 32>}, {transform_indices = @transform_5, window_bounds = array<i64: 1, 16, 32>}]} {
    %c0 = arith.constant 0 : index
    %c0_0 = arith.constant 0 : index
    %c0_1 = arith.constant 0 : index
    %0 = vector.load %arg1[%c0, %c0_0, %c0_1] : memref<1x18x16xf32, #tpu.memory_space<vmem>>, vector<1x18x16xf32>
    %1 = vector.shape_cast %0 : vector<1x18x16xf32> to vector<18x16xf32>
    %cst = arith.constant 0.000000e+00 : f32
    %2 = vector.broadcast %cst : f32 to vector<16x32xf32>
    %3 = vector.extract_strided_slice %1 {offsets = [0, 0], sizes = [16, 16], strides = [1, 1]} : vector<18x16xf32> to vector<16x16xf32>
    %c0_2 = arith.constant 0 : index
    %c0_3 = arith.constant 0 : index
    %c0_4 = arith.constant 0 : index
    %4 = vector.load %arg2[%c0_2, %c0_3, %c0_4] : memref<2x16x32xf32, #tpu.memory_space<vmem>>, vector<1x16x32xf32>
    %5 = vector.shape_cast %4 : vector<1x16x32xf32> to vector<16x32xf32>
    %cst_5 = arith.constant dense<0.000000e+00> : vector<16x32xf32>
    %6 = tpu.matmul %3, %5, %cst_5 {dimension_numbers = #tpu.dot_dimension_numbers<[1], [0], [0], [1], [0, 0, 1, 1], [], []>} : vector<16x16xf32>, vector<16x32xf32>, vector<16x32xf32> -> vector<16x32xf32>
    %7 = arith.addf %2, %6 : vector<16x32xf32>
    %8 = vector.extract_strided_slice %1 {offsets = [2, 0], sizes = [16, 16], strides = [1, 1]} : vector<18x16xf32> to vector<16x16xf32>
    %c1 = arith.constant 1 : index
    %c0_6 = arith.constant 0 : index
    %c0_7 = arith.constant 0 : index
    %9 = vector.load %arg2[%c1, %c0_6, %c0_7] : memref<2x16x32xf32, #tpu.memory_space<vmem>>, vector<1x16x32xf32>
    %10 = vector.shape_cast %9 : vector<1x16x32xf32> to vector<16x32xf32>
    %cst_8 = arith.constant dense<0.000000e+00> : vector<16x32xf32>
    %11 = tpu.matmul %8, %10, %cst_8 {dimension_numbers = #tpu.dot_dimension_numbers<[1], [0], [0], [1], [0, 0, 1, 1], [], []>} : vector<16x16xf32>, vector<16x32xf32>, vector<16x32xf32> -> vector<16x32xf32>
    %12 = arith.addf %7, %11 : vector<16x32xf32>
    %c0_9 = arith.constant 0 : index
    %c0_10 = arith.constant 0 : index
    %13 = vector.load %arg3[%c0_9, %c0_10] : memref<1x32xf32, #tpu.memory_space<vmem>>, vector<1x32xf32>
    %14 = vector.broadcast %13 : vector<1x32xf32> to vector<16x32xf32>
    %15 = arith.addf %12, %14 : vector<16x32xf32>
    %cst_11 = arith.constant 0.000000e+00 : f32
    %16 = vector.broadcast %cst_11 : f32 to vector<16x32xf32>
    %17 = arith.maximumf %15, %16 : vector<16x32xf32>
    %18 = vector.extract_strided_slice %1 {offsets = [2, 0], sizes = [16, 16], strides = [1, 1]} : vector<18x16xf32> to vector<16x16xf32>
    %c0_12 = arith.constant 0 : index
    %c0_13 = arith.constant 0 : index
    %19 = vector.load %arg4[%c0_12, %c0_13] : memref<16x32xf32, #tpu.memory_space<vmem>>, vector<16x32xf32>
    %cst_14 = arith.constant dense<0.000000e+00> : vector<16x32xf32>
    %20 = tpu.matmul %18, %19, %cst_14 {dimension_numbers = #tpu.dot_dimension_numbers<[1], [0], [0], [1], [0, 0, 1, 1], [], []>} : vector<16x16xf32>, vector<16x32xf32>, vector<16x32xf32> -> vector<16x32xf32>
    %c0_15 = arith.constant 0 : index
    %c0_16 = arith.constant 0 : index
    %21 = vector.load %arg5[%c0_15, %c0_16] : memref<1x32xf32, #tpu.memory_space<vmem>>, vector<1x32xf32>
    %22 = vector.broadcast %21 : vector<1x32xf32> to vector<16x32xf32>
    %23 = arith.addf %20, %22 : vector<16x32xf32>
    %24 = arith.addf %17, %23 : vector<16x32xf32>
    %cst_17 = arith.constant 0.000000e+00 : f32
    %25 = vector.broadcast %cst_17 : f32 to vector<16x32xf32>
    %26 = arith.maximumf %24, %25 : vector<16x32xf32>
    %27 = vector.shape_cast %26 : vector<16x32xf32> to vector<1x16x32xf32>
    %c0_18 = arith.constant 0 : index
    %c0_19 = arith.constant 0 : index
    %c0_20 = arith.constant 0 : index
    %28 = vector.load %arg6[%c0_18, %c0_19, %c0_20] : memref<1x16x32xf32, #tpu.memory_space<vmem>>, vector<1x16x32xf32>
    tpu.vector_store %arg6[%c0_18, %c0_19, %c0_20], %27 {strides = array<i32>} : memref<1x16x32xf32, #tpu.memory_space<vmem>>, vector<1x16x32xf32>,
    return
  }
  func.func @transform_0(%arg0: i32) -> (i32, i32, i32) {
    %c0_i32 = arith.constant 0 : i32
    %c0_i32_0 = arith.constant 0 : i32
    %c0_i32_1 = arith.constant 0 : i32
    return %arg0, %c0_i32, %c0_i32_0 : i32, i32, i32
  }
  func.func @transform_1(%arg0: i32) -> (i32, i32, i32) {
    %c0_i32 = arith.constant 0 : i32
    %c0_i32_0 = arith.constant 0 : i32
    %c0_i32_1 = arith.constant 0 : i32
    %c0_i32_2 = arith.constant 0 : i32
    return %c0_i32, %c0_i32_0, %c0_i32_1 : i32, i32, i32
  }
  func.func @transform_2(%arg0: i32) -> (i32, i32) {
    %c0_i32 = arith.constant 0 : i32
    %c0_i32_0 = arith.constant 0 : i32
    %c0_i32_1 = arith.constant 0 : i32
    return %c0_i32, %c0_i32_0 : i32, i32
  }
  func.func @transform_3(%arg0: i32) -> (i32, i32) {
    %c0_i32 = arith.constant 0 : i32
    %c0_i32_0 = arith.constant 0 : i32
    %c0_i32_1 = arith.constant 0 : i32
    return %c0_i32, %c0_i32_0 : i32, i32
  }
  func.func @transform_4(%arg0: i32) -> (i32, i32) {
    %c0_i32 = arith.constant 0 : i32
    %c0_i32_0 = arith.constant 0 : i32
    %c0_i32_1 = arith.constant 0 : i32
    return %c0_i32, %c0_i32_0 : i32, i32
  }
  func.func @transform_5(%arg0: i32) -> (i32, i32, i32) {
    %c0_i32 = arith.constant 0 : i32
    %c0_i32_0 = arith.constant 0 : i32
    %c0_i32_1 = arith.constant 0 : i32
    return %arg0, %c0_i32, %c0_i32_0 : i32, i32, i32
  }
}

module attributes {stable_mosaic.version = 11 : i64} {
  func.func @kernel(%arg0: i32, %arg1: memref<1x20x32xf32, #tpu.memory_space<vmem>>, %arg2: memref<2x32x32xf32, #tpu.memory_space<vmem>>, %arg3: memref<1x32xf32, #tpu.memory_space<vmem>>, %arg4: memref<32x8xf32, #tpu.memory_space<vmem>>, %arg5: memref<1x8xf32, #tpu.memory_space<vmem>>, %arg6: memref<1x16x8xf32, #tpu.memory_space<vmem>>) attributes {dimension_semantics = [#tpu.dimension_semantics<parallel>], iteration_bounds = array<i64: 4>, scalar_prefetch = 0 : i64, scratch_operands = 0 : i64, tpu.core_type = #tpu.core_type<tc>, window_params = [{transform_indices = @transform_0, window_bounds = array<i64: 1, 20, 32>}, {pipeline_mode = #tpu.pipeline_mode<synchronous>, transform_indices = @transform_1, window_bounds = array<i64: 2, 32, 32>}, {pipeline_mode = #tpu.pipeline_mode<synchronous>, transform_indices = @transform_2, window_bounds = array<i64: 1, 32>}, {pipeline_mode = #tpu.pipeline_mode<synchronous>, transform_indices = @transform_3, window_bounds = array<i64: 32, 8>}, {pipeline_mode = #tpu.pipeline_mode<synchronous>, transform_indices = @transform_4, window_bounds = array<i64: 1, 8>}, {transform_indices = @transform_5, window_bounds = array<i64: 1, 16, 8>}]} {
    %c0 = arith.constant 0 : index
    %c0_0 = arith.constant 0 : index
    %c0_1 = arith.constant 0 : index
    %0 = vector.load %arg1[%c0, %c0_0, %c0_1] : memref<1x20x32xf32, #tpu.memory_space<vmem>>, vector<1x20x32xf32>
    %1 = vector.shape_cast %0 : vector<1x20x32xf32> to vector<20x32xf32>
    %cst = arith.constant 0.000000e+00 : f32
    %2 = vector.broadcast %cst : f32 to vector<16x32xf32>
    %3 = vector.extract_strided_slice %1 {offsets = [0, 0], sizes = [16, 32], strides = [1, 1]} : vector<20x32xf32> to vector<16x32xf32>
    %c0_2 = arith.constant 0 : index
    %c0_3 = arith.constant 0 : index
    %c0_4 = arith.constant 0 : index
    %4 = vector.load %arg2[%c0_2, %c0_3, %c0_4] : memref<2x32x32xf32, #tpu.memory_space<vmem>>, vector<1x32x32xf32>
    %5 = vector.shape_cast %4 : vector<1x32x32xf32> to vector<32x32xf32>
    %cst_5 = arith.constant dense<0.000000e+00> : vector<16x32xf32>
    %6 = tpu.matmul %3, %5, %cst_5 {dimension_numbers = #tpu.dot_dimension_numbers<[1], [0], [0], [1], [0, 0, 1, 1], [], []>} : vector<16x32xf32>, vector<32x32xf32>, vector<16x32xf32> -> vector<16x32xf32>
    %7 = arith.addf %2, %6 : vector<16x32xf32>
    %8 = vector.extract_strided_slice %1 {offsets = [4, 0], sizes = [16, 32], strides = [1, 1]} : vector<20x32xf32> to vector<16x32xf32>
    %c1 = arith.constant 1 : index
    %c0_6 = arith.constant 0 : index
    %c0_7 = arith.constant 0 : index
    %9 = vector.load %arg2[%c1, %c0_6, %c0_7] : memref<2x32x32xf32, #tpu.memory_space<vmem>>, vector<1x32x32xf32>
    %10 = vector.shape_cast %9 : vector<1x32x32xf32> to vector<32x32xf32>
    %cst_8 = arith.constant dense<0.000000e+00> : vector<16x32xf32>
    %11 = tpu.matmul %8, %10, %cst_8 {dimension_numbers = #tpu.dot_dimension_numbers<[1], [0], [0], [1], [0, 0, 1, 1], [], []>} : vector<16x32xf32>, vector<32x32xf32>, vector<16x32xf32> -> vector<16x32xf32>
    %12 = arith.addf %7, %11 : vector<16x32xf32>
    %c0_9 = arith.constant 0 : index
    %c0_10 = arith.constant 0 : index
    %13 = vector.load %arg3[%c0_9, %c0_10] : memref<1x32xf32, #tpu.memory_space<vmem>>, vector<1x32xf32>
    %14 = vector.broadcast %13 : vector<1x32xf32> to vector<16x32xf32>
    %15 = arith.addf %12, %14 : vector<16x32xf32>
    %cst_11 = arith.constant 0.000000e+00 : f32
    %16 = vector.broadcast %cst_11 : f32 to vector<16x32xf32>
    %17 = arith.maximumf %15, %16 : vector<16x32xf32>
    %18 = vector.extract_strided_slice %1 {offsets = [4, 0], sizes = [16, 32], strides = [1, 1]} : vector<20x32xf32> to vector<16x32xf32>
    %19 = arith.addf %17, %18 : vector<16x32xf32>
    %cst_12 = arith.constant 0.000000e+00 : f32
    %20 = vector.broadcast %cst_12 : f32 to vector<16x32xf32>
    %21 = arith.maximumf %19, %20 : vector<16x32xf32>
    %c0_13 = arith.constant 0 : index
    %c0_14 = arith.constant 0 : index
    %22 = vector.load %arg4[%c0_13, %c0_14] : memref<32x8xf32, #tpu.memory_space<vmem>>, vector<32x8xf32>
    %cst_15 = arith.constant dense<0.000000e+00> : vector<16x8xf32>
    %23 = tpu.matmul %21, %22, %cst_15 {dimension_numbers = #tpu.dot_dimension_numbers<[1], [0], [0], [1], [0, 0, 1, 1], [], []>} : vector<16x32xf32>, vector<32x8xf32>, vector<16x8xf32> -> vector<16x8xf32>
    %c0_16 = arith.constant 0 : index
    %c0_17 = arith.constant 0 : index
    %24 = vector.load %arg5[%c0_16, %c0_17] : memref<1x8xf32, #tpu.memory_space<vmem>>, vector<1x8xf32>
    %25 = vector.broadcast %24 : vector<1x8xf32> to vector<16x8xf32>
    %26 = arith.addf %23, %25 : vector<16x8xf32>
    %27 = vector.shape_cast %26 : vector<16x8xf32> to vector<1x16x8xf32>
    %c0_18 = arith.constant 0 : index
    %c0_19 = arith.constant 0 : index
    %c0_20 = arith.constant 0 : index
    %28 = vector.load %arg6[%c0_18, %c0_19, %c0_20] : memref<1x16x8xf32, #tpu.memory_space<vmem>>, vector<1x16x8xf32>
    tpu.vector_store %arg6[%c0_18, %c0_19, %c0_20], %27 {strides = array<i32>} : memref<1x16x8xf32, #tpu.memory_space<vmem>>, vector<1x16x8xf32>,
    return
  }
  func.func @transform_0(%arg0: i32) -> (i32, i32, i32) {
    %c0_i32 = arith.constant 0 : i32
    %c0_i32_0 = arith.constant 0 : i32
    %c0_i32_1 = arith.constant 0 : i32
    return %arg0, %c0_i32, %c0_i32_0 : i32, i32, i32
  }
  func.func @transform_1(%arg0: i32) -> (i32, i32, i32) {
    %c0_i32 = arith.constant 0 : i32
    %c0_i32_0 = arith.constant 0 : i32
    %c0_i32_1 = arith.constant 0 : i32
    %c0_i32_2 = arith.constant 0 : i32
    return %c0_i32, %c0_i32_0, %c0_i32_1 : i32, i32, i32
  }
  func.func @transform_2(%arg0: i32) -> (i32, i32) {
    %c0_i32 = arith.constant 0 : i32
    %c0_i32_0 = arith.constant 0 : i32
    %c0_i32_1 = arith.constant 0 : i32
    return %c0_i32, %c0_i32_0 : i32, i32
  }
  func.func @transform_3(%arg0: i32) -> (i32, i32) {
    %c0_i32 = arith.constant 0 : i32
    %c0_i32_0 = arith.constant 0 : i32
    %c0_i32_1 = arith.constant 0 : i32
    return %c0_i32, %c0_i32_0 : i32, i32
  }
  func.func @transform_4(%arg0: i32) -> (i32, i32) {
    %c0_i32 = arith.constant 0 : i32
    %c0_i32_0 = arith.constant 0 : i32
    %c0_i32_1 = arith.constant 0 : i32
    return %c0_i32, %c0_i32_0 : i32, i32
  }
  func.func @transform_5(%arg0: i32) -> (i32, i32, i32) {
    %c0_i32 = arith.constant 0 : i32
    %c0_i32_0 = arith.constant 0 : i32
    %c0_i32_1 = arith.constant 0 : i32
    return %arg0, %c0_i32, %c0_i32_0 : i32, i32, i32
  }
}

</mosaic_0001>

<bundles_post_ra>
// kernel: tcn_forward.4
= control target key start
LH: loop header
LB: loop body
LE: loop exit
PB: predicated region body
PF: predicated region fallthrough
CT: control target
= control target key end

     0   :  { %s466_s18 = smov 0   ;;  %s511_s0 = inlined_call_operand.vmem [shape: f32[4,18,16], index: 0, kind: input, shape index: {}]   ;;  %s512_s1 = inlined_call_operand.vmem [shape: f32[2,16,32], index: 1, kind: input, shape index: {}]   ;;  %s513_s2 = inlined_call_operand.vmem [shape: f32[1,32], index: 2, kind: input, shape index: {}]   ;;  %s514_s3 = inlined_call_operand.vmem [shape: f32[16,32], index: 3, kind: input, shape index: {}]   ;;  %s515_s4 = inlined_call_operand.vmem [shape: f32[1,32], index: 4, kind: input, shape index: {}]   ;;  %s516_s5 = inlined_call_operand.vmem [shape: f32[4,16,32], index: 5, kind: output, shape index: {}]  }
   0x1 LB: > { %s396_s19 = sadd.s32 4294967295, %s434_s18   ;;  %p400_p0 = scmp.ge.s32.totalorder %s434_s18, 1  ;;  %s434_s18 = sphi %s466_s18, %s15_s18  }
   0x2   : > { %p187_p1 = scmp.lt.s32.totalorder %s434_s18, 5 }
   0x4   : > { %p188_p2 = pnand %p400_p0, %p187_p1 }
   0x5   : > { %p215_p3 = scmp.lt.s32.totalorder (!%p188_p2), %s396_s19, 3 }
   0x6   : > { %191 = sbr.rel (%p188_p2) target bundleno = 166 (0xa6), region = 40 }
   0xb   : > { %v306_v0 = vld [vmem:[%s514_s3 + $0x8] sm:$0xff]  ;;  %v405_v1 = vld [vmem:[%s512_s1 + $0x18] sm:$0xff]  ;;  %v305_v3 = vld [vmem:[%s514_s3] sm:$0xff]  ;;  %s518_s19 = smov (!%p215_p3, %s396_s19), 3  ;;  %vm236_vm0 = vcmask 1045504   ;;  %vm242_vm1 = vcmask 130048  }
   0xc   : > { %v229_v2 = vld [vmem:[%s512_s1 + $0x8] sm:$0xff]  ;;  %325 = vmatpush.msra.mxu2 %v306_v0  ;;  %261 = vmatpush.msra.mxu0 %v405_v1  ;;  %v404_v4 = vld [vmem:[%s512_s1 + $0x10] sm:$0xff]  ;;  %v228_v5 = vld [vmem:[%s512_s1] sm:$0xff]  ;;  %s417_s7 = smul.u32 24, %s518_s19  ;;  %s414_s15 = sshll.u32 %s518_s19, 4  ;;  %vm338_vm2 = vcmask 261120  }
   0xd   : > { %288 = vmatpush.msra.mxu1 %v229_v2  ;;  %415 = vmatpush.msra.mxu3 %v405_v1  ;;  %v426_v15 = vld [vmem:[%s513_s2] ss:$0 sm:$0xff]  ;;  %s224_s20 = scalar_lea.vmem %s516_s5, %s414_s15 }
   0xe   : > { %326 = vmatpush.msra.mxu2 %v305_v3  ;;  %262 = vmatpush.msra.mxu0 %v404_v4  ;;  %s219_s10 = scalar_lea.vmem %s511_s0, %s417_s7  ;;  %v427_v19 = vld [vmem:[%s515_s4] ss:$0 sm:$0xff] }
   0xf   : > { %289 = vmatpush.msra.mxu1 %v228_v5  ;;  %416 = vmatpush.msra.mxu3 %v404_v4  ;;  %v225_v6 = vld [vmem:[%s219_s10] sm:$0xff]  ;;  %v226_v7 = vld [vmem:[%s219_s10 + $0x8] sm:$0xff]  ;;  %v227_v8 = vld [vmem:[%s219_s10 + $0x10] sm:$0x3] }
  0x10   : > { %v237_v9 = vrot.slane %v225_v6, 2  ;;  %v238_v10 = vrot.slane %v226_v7, 2  ;;  %408 = vmatmul.msk.f32.vlgmr.msra.gmra.mxu1 %vm242_vm1, %v225_v6  ;;  %v240_v11 = vrot.slane %v227_v8, 2 }
  0x12   : > { %v239_v12 = vsel %vm236_vm0, %v237_v9, %v238_v10  ;;  %v241_v13 = vsel %vm236_vm0, %v238_v10, %v240_v11 }
  0x13   : > { %410 = vmatmul.msk.f32.vlgmr.msra.gmra.mxu2 %vm242_vm1, %v239_v12  ;;  %406 = vmatmul.msk.f32.vlgmr.msra.gmra.mxu0 %vm242_vm1, %v239_v12 }
  0x14   : > { %407 = vmatmul.msk.f32.vlgmr.msra.gmra.mxu3 %vm242_vm1, %v241_v13 }
  0x18   : > { %409 = vmatmul.msk.f32.gmra.mxu1 %vm242_vm1, %v226_v7 }
  0x1b   : > { %411 = vmatmul.msk.f32.gmra.mxu2 %vm242_vm1, %v241_v13 }
  0x8d   : > { %v291_v14 = vpop.f32.mrf.mxu1 }
  0x90   : > { %v264_v16 = vpop.f32.mrf.mxu0 }
  0x91   : > { %v292_v17 = vadd.f32 %v291_v14, %v264_v16 }
  0x93   : > { %v301_v18 = vadd.f32 %v426_v15, %v292_v17 }
  0x95   : > { %v303_v20 = vmax.f32 %v301_v18, 0.0  ;;  %v294_v21 = vpop.f32.mrf.mxu1 }
  0x96   : > { %v328_v22 = vpop.f32.mrf.mxu2 }
  0x97   : > { %v329_v23 = vadd.f32 %v427_v19, %v328_v22  ;;  %v267_v24 = vpop.f32.mrf.mxu3 }
  0x98   : > { %v295_v25 = vadd.f32 %v294_v21, %v267_v24 }
  0x99   : > { %v334_v26 = vadd.f32 %v329_v23, %v303_v20 }
  0x9a   : > { %v302_v27 = vadd.f32 %v426_v15, %v295_v25 }
  0x9b   : > { %v336_v28 = vmax.f32 %v334_v26, 0.0 }
  0x9c   : > { %v304_v29 = vmax.f32 %v302_v27, 0.0 }
  0x9d   : > { %339 = vst.msk [vmem:[%s224_s20] sm:$0xff] %vm338_vm2, %v336_v28 }
  0x9e   : > { %v331_v30 = vpop.f32.mrf.mxu2 }
  0x9f   : > { %v332_v31 = vadd.f32 %v427_v19, %v331_v30 }
  0xa1   : > { %v335_v32 = vadd.f32 %v332_v31, %v304_v29 }
  0xa3   : > { %v337_v33 = vmax.f32 %v335_v32, 0.0 }
  0xa5   : > { %340 = vst.msk [vmem:[%s224_s20 + $0x8] sm:$0xff] %vm338_vm2, %v337_v33 }
  0xa6 PF: > { %s15_s18 = sadd.s32 1, %s434_s18  }
  0xa7   : > { %p12_p4 = scmp.ge.s32.totalorder %s15_s18, 6  }
  0xa9   :  { %14 = sbr.rel (!%p12_p4) target bundleno = 1 (0x1), region = 71 }

// kernel: tcn_forward.3
= control target key start
LH: loop header
LB: loop body
LE: loop exit
PB: predicated region body
PF: predicated region fallthrough
CT: control target
= control target key end

     0   :  { %s461_s18 = smov 0   ;;  %s497_s0 = inlined_call_operand.vmem [shape: f32[4,17,8], index: 0, kind: input, shape index: {}]   ;;  %s498_s1 = inlined_call_operand.vmem [shape: f32[2,8,16], index: 1, kind: input, shape index: {}]   ;;  %s499_s2 = inlined_call_operand.vmem [shape: f32[1,16], index: 2, kind: input, shape index: {}]   ;;  %s500_s3 = inlined_call_operand.vmem [shape: f32[8,16], index: 3, kind: input, shape index: {}]   ;;  %s501_s4 = inlined_call_operand.vmem [shape: f32[1,16], index: 4, kind: input, shape index: {}]   ;;  %s502_s5 = inlined_call_operand.vmem [shape: f32[4,16,16], index: 5, kind: output, shape index: {}]  }
   0x1 LB: > { %s393_s19 = sadd.s32 4294967295, %s429_s18   ;;  %p397_p0 = scmp.ge.s32.totalorder %s429_s18, 1  ;;  %s429_s18 = sphi %s461_s18, %s15_s18  }
   0x2   : > { %p187_p1 = scmp.lt.s32.totalorder %s429_s18, 5 }
   0x4   : > { %p188_p2 = pnand %p397_p0, %p187_p1 }
   0x5   : > { %p215_p3 = scmp.lt.s32.totalorder (!%p188_p2), %s393_s19, 3 }
   0x6   : > { %191 = sbr.rel (%p188_p2) target bundleno = 166 (0xa6), region = 40 }
   0xb   : > { %v303_v0 = vld [vmem:[%s500_s3] sm:$0xff]  ;;  %v401_v1 = vld [vmem:[%s498_s1 + $0x8] sm:$0xff]  ;;  %s504_s19 = smov (!%p215_p3, %s393_s19), 3  ;;  %vm234_vm0 = vcmask 1046528   ;;  %vm240_vm1 = vcmask 64512   ;;  %vm335_vm2 = vcmask 130048  }
   0xc   : > { %v228_v2 = vld [vmem:[%s498_s1] sm:$0xff]  ;;  %323 = vmatpush.msra.mxu2 %v303_v0  ;;  %260 = vmatpush.msra.mxu0 %v401_v1  ;;  %s412_s26 = smul.u32 24, %s504_s19  ;;  %s410_s9 = sshll.u32 %s504_s19, 4 }
   0xd   : > { %287 = vmatpush.msra.mxu1 %v228_v2  ;;  %411 = vmatpush.msra.mxu3 %v401_v1  ;;  %v421_v12 = vld [vmem:[%s499_s2] ss:$0 sm:$0xff]  ;;  %s224_s12 = scalar_lea.vmem %s502_s5, %s410_s9 }
   0xe   : > { %s219_s29 = scalar_lea.vmem %s497_s0, %s412_s26  ;;  %v422_v16 = vld [vmem:[%s501_s4] ss:$0 sm:$0xff] }
   0xf   : > { %v225_v3 = vld [vmem:[%s219_s29] sm:$0xff]  ;;  %v226_v4 = vld [vmem:[%s219_s29 + $0x8] sm:$0xff]  ;;  %v227_v5 = vld [vmem:[%s219_s29 + $0x10] sm:$0x1] }
  0x10   : > { %v235_v6 = vrot.slane %v225_v3, 1  ;;  %v236_v7 = vrot.slane %v226_v4, 1  ;;  %404 = vmatmul.msk.f32.vlgmr.msra.gmra.mxu1 %vm240_vm1, %v225_v3  ;;  %v238_v8 = vrot.slane %v227_v5, 1 }
  0x12   : > { %v237_v9 = vsel %vm234_vm0, %v235_v6, %v236_v7  ;;  %v239_v10 = vsel %vm234_vm0, %v236_v7, %v238_v8 }
  0x13   : > { %406 = vmatmul.msk.f32.vlgmr.msra.gmra.mxu2 %vm240_vm1, %v237_v9  ;;  %402 = vmatmul.msk.f32.vlgmr.msra.gmra.mxu0 %vm240_vm1, %v237_v9 }
  0x14   : > { %403 = vmatmul.msk.f32.vlgmr.msra.gmra.mxu3 %vm240_vm1, %v239_v10 }
  0x18   : > { %405 = vmatmul.msk.f32.gmra.mxu1 %vm240_vm1, %v226_v4 }
  0x1b   : > { %407 = vmatmul.msk.f32.gmra.mxu2 %vm240_vm1, %v239_v10 }
  0x8d   : > { %v289_v11 = vpop.f32.mrf.mxu1 }
  0x90   : > { %v262_v13 = vpop.f32.mrf.mxu0 }
  0x91   : > { %v290_v14 = vadd.f32 %v289_v11, %v262_v13 }
  0x93   : > { %v299_v15 = vadd.f32 %v421_v12, %v290_v14 }
  0x95   : > { %v301_v17 = vmax.f32 %v299_v15, 0.0  ;;  %v292_v18 = vpop.f32.mrf.mxu1 }
  0x96   : > { %v325_v19 = vpop.f32.mrf.mxu2 }
  0x97   : > { %v326_v20 = vadd.f32 %v422_v16, %v325_v19  ;;  %v265_v21 = vpop.f32.mrf.mxu3 }
  0x98   : > { %v293_v22 = vadd.f32 %v292_v18, %v265_v21 }
  0x99   : > { %v331_v23 = vadd.f32 %v326_v20, %v301_v17 }
  0x9a   : > { %v300_v24 = vadd.f32 %v421_v12, %v293_v22 }
  0x9b   : > { %v333_v25 = vmax.f32 %v331_v23, 0.0 }
  0x9c   : > { %v302_v26 = vmax.f32 %v300_v24, 0.0 }
  0x9d   : > { %336 = vst.msk [vmem:[%s224_s12] sm:$0xff] %vm335_vm2, %v333_v25 }
  0x9e   : > { %v328_v27 = vpop.f32.mrf.mxu2 }
  0x9f   : > { %v329_v28 = vadd.f32 %v422_v16, %v328_v27 }
  0xa1   : > { %v332_v29 = vadd.f32 %v329_v28, %v302_v26 }
  0xa3   : > { %v334_v30 = vmax.f32 %v332_v29, 0.0 }
  0xa5   : > { %337 = vst.msk [vmem:[%s224_s12 + $0x8] sm:$0xff] %vm335_vm2, %v334_v30 }
  0xa6 PF: > { %s15_s18 = sadd.s32 1, %s429_s18  }
  0xa7   : > { %p12_p4 = scmp.ge.s32.totalorder %s15_s18, 6  }
  0xa9   :  { %14 = sbr.rel (!%p12_p4) target bundleno = 1 (0x1), region = 71 }

// kernel: tcn_forward.5
= control target key start
LH: loop header
LB: loop body
LE: loop exit
PB: predicated region body
PF: predicated region fallthrough
CT: control target
= control target key end

     0   :  { %s484_s18 = smov 0   ;;  %s553_s0 = inlined_call_operand.vmem [shape: f32[4,20,32], index: 0, kind: input, shape index: {}]   ;;  %s554_s1 = inlined_call_operand.vmem [shape: f32[2,32,32], index: 1, kind: input, shape index: {}]   ;;  %s555_s2 = inlined_call_operand.vmem [shape: f32[1,32], index: 2, kind: input, shape index: {}]   ;;  %s556_s3 = inlined_call_operand.vmem [shape: f32[32,8], index: 3, kind: input, shape index: {}]   ;;  %s557_s4 = inlined_call_operand.vmem [shape: f32[1,8], index: 4, kind: input, shape index: {}]   ;;  %s558_s5 = inlined_call_operand.vmem [shape: f32[4,16,8], index: 5, kind: output, shape index: {}]  }
   0x1 LB: > { %s410_s19 = sadd.s32 4294967295, %s452_s18   ;;  %p414_p0 = scmp.ge.s32.totalorder %s452_s18, 1  ;;  %s452_s18 = sphi %s484_s18, %s15_s18  }
   0x2   : > { %p187_p1 = scmp.lt.s32.totalorder %s452_s18, 5 }
   0x4   : > { %p188_p2 = pnand %p414_p0, %p187_p1 }
   0x5   : > { %p215_p3 = scmp.lt.s32.totalorder (!%p188_p2), %s410_s19, 3 }
   0x6   : > { %191 = sbr.rel (%p188_p2) target bundleno = 299 (0x12b), region = 40 }
   0xb   : > { %v421_v0 = vld [vmem:[%s554_s1 + $0x38] sm:$0xff]  ;;  %v420_v2 = vld [vmem:[%s554_s1 + $0x30] sm:$0xff]  ;;  %v419_v4 = vld [vmem:[%s554_s1 + $0x28] sm:$0xff]  ;;  %s560_s19 = smov (!%p215_p3, %s410_s19), 3  ;;  %vm246_vm0 = vcmask 261120   ;;  %vm240_vm1 = vcmask 1043456  }
   0xc   : > { %v231_v1 = vld [vmem:[%s554_s1 + $0x18] sm:$0xff]  ;;  %263 = vmatpush.msra.mxu0 %v421_v0  ;;  %v230_v3 = vld [vmem:[%s554_s1 + $0x10] sm:$0xff]  ;;  %431 = vmatpush.msra.mxu3 %v421_v0  ;;  %v229_v5 = vld [vmem:[%s554_s1 + $0x8] sm:$0xff]  ;;  %s435_s11 = smul.u32 24, %s560_s19  ;;  %s430_s27 = sshll.u32 %s560_s19, 4  ;;  %vm352_vm2 = vcmask 64512  }
   0xd   : > { %290 = vmatpush.msra.mxu1 %v231_v1  ;;  %v418_v6 = vld [vmem:[%s554_s1 + $0x20] sm:$0xff]  ;;  %v318_v16 = vld [vmem:[%s556_s3 + $0x18] sm:$0xff]  ;;  %v317_v17 = vld [vmem:[%s556_s3 + $0x10] sm:$0xff]  ;;  %s224_s7 = scalar_lea.vmem %s558_s5, %s430_s27 }
   0xe   : > { %264 = vmatpush.msra.mxu0 %v420_v2  ;;  %432 = vmatpush.msra.mxu3 %v420_v2  ;;  %v228_v7 = vld [vmem:[%s554_s1] sm:$0xff]  ;;  %s219_s14 = scalar_lea.vmem %s553_s0, %s435_s11  ;;  %v316_v18 = vld [vmem:[%s556_s3 + $0x8] sm:$0xff] }
   0xf   : > { %291 = vmatpush.msra.mxu1 %v230_v3  ;;  %v225_v8 = vld [vmem:[%s219_s14] sm:$0xff]  ;;  %v226_v9 = vld [vmem:[%s219_s14 + $0x8] sm:$0xff]  ;;  %v227_v10 = vld [vmem:[%s219_s14 + $0x10] sm:$0xf]  ;;  %341 = vmatpush.msra.mxu2 %v318_v16 }
  0x10   : > { %265 = vmatpush.msra.mxu0 %v419_v4  ;;  %433 = vmatpush.msra.mxu3 %v419_v4  ;;  %v241_v11 = vrot.slane %v225_v8, 4  ;;  %v242_v12 = vrot.slane %v226_v9, 4  ;;  %v244_v13 = vrot.slane %v227_v10, 4  ;;  %v315_v19 = vld [vmem:[%s556_s3] sm:$0xff] }
  0x11   : > { %292 = vmatpush.msra.mxu1 %v229_v5  ;;  %342 = vmatpush.msra.mxu2 %v317_v17  ;;  %v444_v21 = vld [vmem:[%s555_s2] ss:$0 sm:$0xff] }
  0x12   : > { %266 = vmatpush.msra.mxu0 %v418_v6  ;;  %434 = vmatpush.msra.mxu3 %v418_v6  ;;  %v243_v14 = vsel %vm240_vm1, %v241_v11, %v242_v12  ;;  %v245_v15 = vsel %vm240_vm1, %v242_v12, %v244_v13  ;;  %v445_v35 = vld [vmem:[%s557_s4] ss:$0 sm:$0xff] }
  0x13   : > { %293 = vmatpush.msra.mxu1 %v228_v7  ;;  %422 = vmatmul.msk.f32.vlgmr.msra.gmra.mxu0 %vm246_vm0, %v243_v14 }
  0x14   : > { %424 = vmatmul.msk.f32.vlgmr.msra.gmra.mxu1 %vm246_vm0, %v225_v8  ;;  %423 = vmatmul.msk.f32.vlgmr.msra.gmra.mxu3 %vm246_vm0, %v245_v15 }
  0x15   : > { %343 = vmatpush.msra.mxu2 %v316_v18 }
  0x17   : > { %344 = vmatpush.msra.mxu2 %v315_v19 }
  0x1c   : > { %425 = vmatmul.msk.f32.gmra.mxu1 %vm246_vm0, %v226_v9 }
  0x90   : > { %v268_v22 = vpop.f32.mrf.mxu0 }
  0x91   : > { %v295_v20 = vpop.f32.mrf.mxu1 }
  0x92   : > { %v296_v23 = vadd.f32 %v295_v20, %v268_v22 }
  0x94   : > { %v305_v24 = vadd.f32 %v444_v21, %v296_v23 }
  0x96   : > { %v307_v25 = vmax.f32 %v305_v24, 0.0 }
  0x97   : > { %v271_v27 = vpop.f32.mrf.mxu3 }
  0x98   : > { %v311_v29 = vadd.f32 %v307_v25, %v243_v14 }
  0x99   : > { %v298_v26 = vpop.f32.mrf.mxu1 }
  0x9a   : > { %v299_v28 = vadd.f32 %v298_v26, %v271_v27  ;;  %v313_v31 = vmax.f32 %v311_v29, 0.0 }
  0x9c   : > { %v306_v30 = vadd.f32 %v444_v21, %v299_v28  ;;  %426 = vmatmul.msk.f32.vlgmr.msra.gmra.mxu2 %vm246_vm0, %v313_v31 }
  0x9e   : > { %v308_v32 = vmax.f32 %v306_v30, 0.0 }
  0xa0   : > { %v312_v33 = vadd.f32 %v308_v32, %v245_v15 }
  0xa2   : > { %v314_v34 = vmax.f32 %v312_v33, 0.0 }
  0xa4   : > { %427 = vmatmul.msk.f32.gmra.mxu2 %vm246_vm0, %v314_v34 }
 0x11f   : > { %v346_v36 = vpop.f32.mrf.mxu2 }
 0x120   : > { %v347_v37 = vadd.f32 %v445_v35, %v346_v36 }
 0x122   : > { %353 = vst.msk [vmem:[%s224_s7] sm:$0xff] %vm352_vm2, %v347_v37 }
 0x127   : > { %v349_v38 = vpop.f32.mrf.mxu2 }
 0x128   : > { %v350_v39 = vadd.f32 %v445_v35, %v349_v38 }
 0x12a   : > { %354 = vst.msk [vmem:[%s224_s7 + $0x8] sm:$0xff] %vm352_vm2, %v350_v39 }
 0x12b PF: > { %s15_s18 = sadd.s32 1, %s452_s18  }
 0x12c   : > { %p12_p4 = scmp.ge.s32.totalorder %s15_s18, 6  }
 0x12e   :  { %14 = sbr.rel (!%p12_p4) target bundleno = 1 (0x1), region = 71 }

</bundles_post_ra>
